<compile_context>
chip_gen: v7x
topology: tpu7x:2x2x1
jax: 0.10.0
libtpu: 0.0.40
codegen_flags: <defaults>
</compile_context>

<pallas_src>
import functools

import jax
import jax.numpy as jnp
from jax.experimental import pallas as pl
from jax.experimental.pallas import tpu as pltpu

INPUT_DIM = 9
H1 = 64
H2 = 128
OUTPUT_DIM = 256

_SINGLE_STEP_MAX_B = 256               # below this, always one grid step
_VMEM_LIMIT_BYTES = 28 * 1024 * 1024   # fits 4096-row tiles; safe on all generations


def _round_up(n, m):
    return ((n + m - 1) // m) * m


def _cdiv(a, b):
    return -(-a // b)


@functools.lru_cache(maxsize=None)
def _tpu_tiling_config():
    """Returns (batch-tile cap, tensorcores per chip) for the local TPU generation."""
    kind = ""
    try:
        kind = jax.devices()[0].device_kind.lower()
    except Exception:
        pass
    # v5e has the smallest scoped-VMEM budget -> smaller batch tile.
    if "v5e" in kind or "v5 lite" in kind or "v5lite" in kind:
        tile_cap = 2048
    else:
        # v6e / v7x: ~21 MiB per 4096-row step.  Do NOT go beyond 4096 on v7x
        # (only 64 MiB physical VMEM / 32 MiB scoped by default).
        tile_cap = 4096
    num_tc = 2 if "v7" in kind else 1   # v7x: 2 TensorCores per chip
    return tile_cap, num_tc


def mlp_encoder_kernel(x_ref, w1_ref, b1_ref, w2_ref, b2_ref, w3_ref, b3_ref, o_ref):
    """Fused 3-layer MLP: (Linear + ReLU) x 3, straight-line MXU/VPU body."""
    x = x_ref[...]
    h1 = jnp.dot(x, w1_ref[...], preferred_element_type=jnp.float32) + b1_ref[...]
    h1 = jnp.maximum(h1, 0.0)
    h2 = jnp.dot(h1, w2_ref[...], preferred_element_type=jnp.float32) + b2_ref[...]
    h2 = jnp.maximum(h2, 0.0)
    h3 = jnp.dot(h2, w3_ref[...], preferred_element_type=jnp.float32) + b3_ref[...]
    h3 = jnp.maximum(h3, 0.0)
    o_ref[...] = h3.astype(o_ref.dtype)


@jax.jit
def mlp_table_encoder(x, w1, b1, w2, b2, w3, b3):
    """x: (B, INPUT_DIM) float32 -> (B, OUTPUT_DIM) float32."""
    B = x.shape[0]
    tile_cap, num_tc = _tpu_tiling_config()

    # Tile selection (B is static under jit):
    #  * small B                -> single step (launch overhead dominates)
    #  * single-TC, B <= cap    -> single step
    #  * otherwise              -> at least `num_tc` steps (so v7x uses both cores),
    #                              capped at the generation-aware tile size.
    if B <= _SINGLE_STEP_MAX_B or (num_tc == 1 and B <= tile_cap):
        tile_b = _round_up(max(B, 1), 8)
    else:
        tile_b = min(tile_cap, _round_up(_cdiv(B, num_tc), 8))
    grid = (_cdiv(B, tile_b),)

    # Advisory cost estimate so XLA schedules around the custom call sensibly.
    flops = 2 * B * (INPUT_DIM * H1 + H1 * H2 + H2 * OUTPUT_DIM)
    weight_bytes = 4 * (
        INPUT_DIM * H1 + H1 + H1 * H2 + H2 + H2 * OUTPUT_DIM + OUTPUT_DIM
    )
    bytes_accessed = B * 4 * (INPUT_DIM + OUTPUT_DIM) + weight_bytes

    out = pl.pallas_call(
        mlp_encoder_kernel,
        out_shape=jax.ShapeDtypeStruct((B, OUTPUT_DIM), jnp.float32),
        grid_spec=pltpu.PrefetchScalarGridSpec(
            num_scalar_prefetch=0,
            grid=grid,
            in_specs=[
                pl.BlockSpec((tile_b, INPUT_DIM), lambda i: (i, 0)),
                pl.BlockSpec((INPUT_DIM, H1), lambda i: (0, 0)),
                pl.BlockSpec((1, H1), lambda i: (0, 0)),
                pl.BlockSpec((H1, H2), lambda i: (0, 0)),
                pl.BlockSpec((1, H2), lambda i: (0, 0)),
                pl.BlockSpec((H2, OUTPUT_DIM), lambda i: (0, 0)),
                pl.BlockSpec((1, OUTPUT_DIM), lambda i: (0, 0)),
            ],
            out_specs=pl.BlockSpec((tile_b, OUTPUT_DIM), lambda i: (i, 0)),
        ),
        compiler_params=pltpu.CompilerParams(
            dimension_semantics=("parallel",),
            vmem_limit_bytes=_VMEM_LIMIT_BYTES,
        ),
        cost_estimate=pl.CostEstimate(
            flops=flops, transcendentals=0, bytes_accessed=bytes_accessed
        ),
    )(x, w1, b1, w2, b2, w3, b3)

    return out


def init_params(key):
    """Synthetic init mimicking PyTorch Linear default (uniform +/- 1/sqrt(fan_in))."""
    ks = jax.random.split(key, 6)

    def linear(kw, kb, fan_in, fan_out):
        bound = 1.0 / jnp.sqrt(fan_in)
        w = jax.random.uniform(kw, (fan_in, fan_out), jnp.float32, -bound, bound)
        b = jax.random.uniform(kb, (1, fan_out), jnp.float32, -bound, bound)
        return w, b

    w1, b1 = linear(ks[0], ks[1], INPUT_DIM, H1)
    w2, b2 = linear(ks[2], ks[3], H1, H2)
    w3, b3 = linear(ks[4], ks[5], H2, OUTPUT_DIM)
    return w1, b1, w2, b2, w3, b3


def reference(x, w1, b1, w2, b2, w3, b3):
    h = jnp.maximum(x @ w1 + b1, 0.0)
    h = jnp.maximum(h @ w2 + b2, 0.0)
    h = jnp.maximum(h @ w3 + b3, 0.0)
    return h


if __name__ == "__main__":
    key = jax.random.PRNGKey(0)
    k_p, k1, k2, k3 = jax.random.split(key, 4)
    params = init_params(k_p)

    # B=2: typical tiny-batch use. B=37: non-multiple-of-8 ragged edge block.
    # B=300: exercises the dual-TC split path on v7x (single step elsewhere).
    for B, kx in ((2, k1), (37, k2), (300, k3)):
        x = jax.random.normal(kx, (B, INPUT_DIM), jnp.float32)
        out = jax.block_until_ready(mlp_table_encoder(x, *params))
        ref = reference(x, *params)
        assert out.shape == (B, OUTPUT_DIM), out.shape
        max_err = float(jnp.max(jnp.abs(out - ref)))
        assert jnp.allclose(out, ref, atol=1e-5, rtol=1e-5), max_err

    print("KERNEL_OK")
</pallas_src>

<mosaic_0001>
module attributes {stable_mosaic.version = 11 : i64} {
  func.func @mlp_encoder_kernel(%arg0: i32, %arg1: memref<8x9xf32, #tpu.memory_space<vmem>>, %arg2: memref<9x64xf32, #tpu.memory_space<vmem>>, %arg3: memref<1x64xf32, #tpu.memory_space<vmem>>, %arg4: memref<64x128xf32, #tpu.memory_space<vmem>>, %arg5: memref<1x128xf32, #tpu.memory_space<vmem>>, %arg6: memref<128x256xf32, #tpu.memory_space<vmem>>, %arg7: memref<1x256xf32, #tpu.memory_space<vmem>>, %arg8: memref<8x256xf32, #tpu.memory_space<vmem>>) attributes {dimension_semantics = [#tpu.dimension_semantics<parallel>], iteration_bounds = array<i64: 1>, scalar_prefetch = 0 : i64, scratch_operands = 0 : i64, tpu.core_type = #tpu.core_type<tc>, window_params = [{transform_indices = @transform_0, window_bounds = array<i64: 8, 9>}, {pipeline_mode = #tpu.pipeline_mode<synchronous>, transform_indices = @transform_1, window_bounds = array<i64: 9, 64>}, {pipeline_mode = #tpu.pipeline_mode<synchronous>, transform_indices = @transform_2, window_bounds = array<i64: 1, 64>}, {pipeline_mode = #tpu.pipeline_mode<synchronous>, transform_indices = @transform_3, window_bounds = array<i64: 64, 128>}, {pipeline_mode = #tpu.pipeline_mode<synchronous>, transform_indices = @transform_4, window_bounds = array<i64: 1, 128>}, {pipeline_mode = #tpu.pipeline_mode<synchronous>, transform_indices = @transform_5, window_bounds = array<i64: 128, 256>}, {pipeline_mode = #tpu.pipeline_mode<synchronous>, transform_indices = @transform_6, window_bounds = array<i64: 1, 256>}, {transform_indices = @transform_7, window_bounds = array<i64: 8, 256>}]} {
    %c0 = arith.constant 0 : index
    %c0_0 = arith.constant 0 : index
    %0 = vector.load %arg1[%c0, %c0_0] : memref<8x9xf32, #tpu.memory_space<vmem>>, vector<8x9xf32>
    %c0_1 = arith.constant 0 : index
    %c0_2 = arith.constant 0 : index
    %1 = vector.load %arg2[%c0_1, %c0_2] : memref<9x64xf32, #tpu.memory_space<vmem>>, vector<9x64xf32>
    %cst = arith.constant dense<0.000000e+00> : vector<8x64xf32>
    %2 = tpu.matmul %0, %1, %cst {dimension_numbers = #tpu.dot_dimension_numbers<[1], [0], [0], [1], [0, 0, 1, 1], [], []>} : vector<8x9xf32>, vector<9x64xf32>, vector<8x64xf32> -> vector<8x64xf32>
    %c0_3 = arith.constant 0 : index
    %c0_4 = arith.constant 0 : index
    %3 = vector.load %arg3[%c0_3, %c0_4] : memref<1x64xf32, #tpu.memory_space<vmem>>, vector<1x64xf32>
    %4 = vector.broadcast %3 : vector<1x64xf32> to vector<8x64xf32>
    %5 = arith.addf %2, %4 : vector<8x64xf32>
    %cst_5 = arith.constant 0.000000e+00 : f32
    %6 = vector.broadcast %cst_5 : f32 to vector<8x64xf32>
    %7 = arith.maximumf %5, %6 : vector<8x64xf32>
    %c0_6 = arith.constant 0 : index
    %c0_7 = arith.constant 0 : index
    %8 = vector.load %arg4[%c0_6, %c0_7] : memref<64x128xf32, #tpu.memory_space<vmem>>, vector<64x128xf32>
    %cst_8 = arith.constant dense<0.000000e+00> : vector<8x128xf32>
    %9 = tpu.matmul %7, %8, %cst_8 {dimension_numbers = #tpu.dot_dimension_numbers<[1], [0], [0], [1], [0, 0, 1, 1], [], []>} : vector<8x64xf32>, vector<64x128xf32>, vector<8x128xf32> -> vector<8x128xf32>
    %c0_9 = arith.constant 0 : index
    %c0_10 = arith.constant 0 : index
    %10 = vector.load %arg5[%c0_9, %c0_10] : memref<1x128xf32, #tpu.memory_space<vmem>>, vector<1x128xf32>
    %11 = vector.broadcast %10 : vector<1x128xf32> to vector<8x128xf32>
    %12 = arith.addf %9, %11 : vector<8x128xf32>
    %cst_11 = arith.constant 0.000000e+00 : f32
    %13 = vector.broadcast %cst_11 : f32 to vector<8x128xf32>
    %14 = arith.maximumf %12, %13 : vector<8x128xf32>
    %c0_12 = arith.constant 0 : index
    %c0_13 = arith.constant 0 : index
    %15 = vector.load %arg6[%c0_12, %c0_13] : memref<128x256xf32, #tpu.memory_space<vmem>>, vector<128x256xf32>
    %cst_14 = arith.constant dense<0.000000e+00> : vector<8x256xf32>
    %16 = tpu.matmul %14, %15, %cst_14 {dimension_numbers = #tpu.dot_dimension_numbers<[1], [0], [0], [1], [0, 0, 1, 1], [], []>} : vector<8x128xf32>, vector<128x256xf32>, vector<8x256xf32> -> vector<8x256xf32>
    %c0_15 = arith.constant 0 : index
    %c0_16 = arith.constant 0 : index
    %17 = vector.load %arg7[%c0_15, %c0_16] : memref<1x256xf32, #tpu.memory_space<vmem>>, vector<1x256xf32>
    %18 = vector.broadcast %17 : vector<1x256xf32> to vector<8x256xf32>
    %19 = arith.addf %16, %18 : vector<8x256xf32>
    %cst_17 = arith.constant 0.000000e+00 : f32
    %20 = vector.broadcast %cst_17 : f32 to vector<8x256xf32>
    %21 = arith.maximumf %19, %20 : vector<8x256xf32>
    %c0_18 = arith.constant 0 : index
    %c0_19 = arith.constant 0 : index
    %22 = vector.load %arg8[%c0_18, %c0_19] : memref<8x256xf32, #tpu.memory_space<vmem>>, vector<8x256xf32>
    tpu.vector_store %arg8[%c0_18, %c0_19], %21 {strides = array<i32>} : memref<8x256xf32, #tpu.memory_space<vmem>>, vector<8x256xf32>,
    return
  }
  func.func @transform_0(%arg0: i32) -> (i32, i32) {
    %c0_i32 = arith.constant 0 : i32
    %c0_i32_0 = arith.constant 0 : i32
    return %arg0, %c0_i32 : i32, i32
  }
  func.func @transform_1(%arg0: i32) -> (i32, i32) {
    %c0_i32 = arith.constant 0 : i32
    %c0_i32_0 = arith.constant 0 : i32
    %c0_i32_1 = arith.constant 0 : i32
    return %c0_i32, %c0_i32_0 : i32, i32
  }
  func.func @transform_2(%arg0: i32) -> (i32, i32) {
    %c0_i32 = arith.constant 0 : i32
    %c0_i32_0 = arith.constant 0 : i32
    %c0_i32_1 = arith.constant 0 : i32
    return %c0_i32, %c0_i32_0 : i32, i32
  }
  func.func @transform_3(%arg0: i32) -> (i32, i32) {
    %c0_i32 = arith.constant 0 : i32
    %c0_i32_0 = arith.constant 0 : i32
    %c0_i32_1 = arith.constant 0 : i32
    return %c0_i32, %c0_i32_0 : i32, i32
  }
  func.func @transform_4(%arg0: i32) -> (i32, i32) {
    %c0_i32 = arith.constant 0 : i32
    %c0_i32_0 = arith.constant 0 : i32
    %c0_i32_1 = arith.constant 0 : i32
    return %c0_i32, %c0_i32_0 : i32, i32
  }
  func.func @transform_5(%arg0: i32) -> (i32, i32) {
    %c0_i32 = arith.constant 0 : i32
    %c0_i32_0 = arith.constant 0 : i32
    %c0_i32_1 = arith.constant 0 : i32
    return %c0_i32, %c0_i32_0 : i32, i32
  }
  func.func @transform_6(%arg0: i32) -> (i32, i32) {
    %c0_i32 = arith.constant 0 : i32
    %c0_i32_0 = arith.constant 0 : i32
    %c0_i32_1 = arith.constant 0 : i32
    return %c0_i32, %c0_i32_0 : i32, i32
  }
  func.func @transform_7(%arg0: i32) -> (i32, i32) {
    %c0_i32 = arith.constant 0 : i32
    %c0_i32_0 = arith.constant 0 : i32
    return %arg0, %c0_i32 : i32, i32
  }
}

</mosaic_0001>

<bundles_post_ra>
// kernel: mlp_table_encoder.1
= control target key start
LH: loop header
LB: loop body
LE: loop exit
PB: predicated region body
PF: predicated region fallthrough
CT: control target
= control target key end

     0   :  { %12 = vsyncpa [#allocation3], 0  ;;  %s796_s0 = inlined_call_operand.hbm [shape: f32[2,9], index: 0, kind: input, shape index: {}]   ;;  %s797_s1 = inlined_call_operand.hbm [shape: f32[9,64], index: 1, kind: input, shape index: {}]   ;;  %s798_s2 = inlined_call_operand.vmem [shape: f32[1,64], index: 2, kind: input, shape index: {}]   ;;  %s799_s3 = inlined_call_operand.hbm [shape: f32[64,128], index: 3, kind: input, shape index: {}]   ;;  %s800_s4 = inlined_call_operand.vmem [shape: f32[1,128], index: 4, kind: input, shape index: {}]   ;;  %s801_s5 = inlined_call_operand.hbm [shape: f32[128,256], index: 5, kind: input, shape index: {}]   ;;  %s802_s6 = inlined_call_operand.vmem [shape: f32[1,256], index: 6, kind: input, shape index: {}]   ;;  %s803_s7 = inlined_call_operand.hbm [shape: f32[2,256], index: 7, kind: output, shape index: {}]  }
   0x1   :  { %13 = vsyncpa [#allocation6], 0 }
   0x2   :  { %14 = vsyncpa [#allocation9], 0 }
   0x3   :  { %15 = vsyncpa [#allocation4], 0 }
   0x4   :  { %20 = vsyncadd [#allocation3], 96  ;;  %s654_s24 = smov [#allocation5]   ;;  %s536_s28 = scalar_lea.hbm %s797_s1, 256 }
   0x5   :  { %s33_s25 = sshll.u32 %s654_s24, 4  ;;  %p537_p0 = scmp.ne.s32.totalorder %s797_s1, %s536_s28  ;;  %s34_s25 = int_to_ptr.vmem [resolvable:$true] %s33_s25 }
   0x6   :  { %p540_p1 = scmp.lt.u32.totalorder %s536_s28, %s797_s1 }
   0x8   :  { %p542_p2 = pnand %p540_p1, %p537_p0 }
   0xa   :  { %545 = shalt.err (!%p542_p2)
}
   0xb   :  { %s546_s10 = scalar_lea.vmem %s34_s25, 256  ;;  %p551_p4 = scmp.lt.s32.totalorder %s34_s25, %s34_s25 }
   0xc   :  { %p547_p3 = scmp.ne.s32.totalorder %s34_s25, %s546_s10  ;;  %p552_p5 = scmp.lt.s32.totalorder %s546_s10, %s546_s10 }
   0xe   :  { %p553_p6 = por %p552_p5, %p551_p4 }
  0x10   :  { %p554_p7 = pnand %p553_p6, %p547_p3 }
  0x12   :  { %557 = shalt.err (!%p554_p7)
}
  0x13   :  { %s655_s11 = smov 128   ;;  %s656_s12 = smov 8  }
  0x14   :  { %39 = dma.hbm_to_vmem [thread:$0]  %s797_s1, 256, %s34_s25, [#allocation6], %s655_s11, %s655_s11, %s656_s12  }
  0x15   :  { %s657_s15 = smov [#allocation2]   ;;  %s558_s19 = scalar_lea.hbm %s796_s0, 32 }
  0x16   :  { %s21_s16 = sshll.u32 %s657_s15, 4  ;;  %p559_p8 = scmp.ne.s32.totalorder %s796_s0, %s558_s19  ;;  %s22_s16 = int_to_ptr.vmem [resolvable:$true] %s21_s16 }
  0x17   :  { %p562_p9 = scmp.lt.u32.totalorder %s558_s19, %s796_s0 }
  0x19   :  { %p564_p10 = pnand %p562_p9, %p559_p8 }
  0x1b   :  { %567 = shalt.err (!%p564_p10)
}
  0x1c   :  { %s568_s24 = scalar_lea.vmem %s22_s16, 32  ;;  %s572_s1 = scalar_lea.vmem %s22_s16, 128 }
  0x1d   :  { %p569_p11 = scmp.ne.s32.totalorder %s22_s16, %s568_s24  ;;  %p573_p12 = scmp.lt.s32.totalorder %s22_s16, %s22_s16 }
  0x1e   :  { %p574_p13 = scmp.lt.s32.totalorder %s572_s1, %s568_s24 }
  0x20   :  { %p575_p0 = por %p574_p13, %p573_p12 }
  0x22   :  { %p576_p1 = pnand %p575_p0, %p569_p11 }
  0x24   :  { %579 = shalt.err (!%p576_p1)
}
  0x25   :  { %s658_s25 = smov 32   ;;  %s659_s26 = smov 2  }
  0x26   :  { %27 = dma.hbm_to_vmem [thread:$0]  %s796_s0, 32, %s22_s16, [#allocation3], %s658_s25, %s658_s25, %s659_s26  }
  0x27   :  { %s660_s29 = smov [#allocation7]   ;;  %s661_s8 = smov [#allocation8]  }
  0x28   :  { %s47_s30 = sshll.u32 %s660_s29, 4  ;;  %s61_s9 = sshll.u32 %s661_s8, 4  ;;  %s48_s30 = int_to_ptr.vmem [resolvable:$true] %s47_s30  ;;  %s739_s9 = int_to_ptr.vmem [resolvable:$true] %s61_s9 }
  0x29   :  { %s580_s14 = scalar_lea.hbm %s799_s3, 1024 }
  0x2a   :  { %p581_p2 = scmp.ne.s32.totalorder %s799_s3, %s580_s14  ;;  %p584_p3 = scmp.lt.u32.totalorder %s580_s14, %s799_s3 }
  0x2c   :  { %p586_p4 = pnand %p584_p3, %p581_p2 }
  0x2e   :  { %589 = shalt.err (!%p586_p4)
}
  0x2f   :  { %s590_s0 = scalar_lea.vmem %s48_s30, 1024  ;;  %p595_p6 = scmp.lt.s32.totalorder %s48_s30, %s48_s30 }
  0x30   :  { %p591_p5 = scmp.ne.s32.totalorder %s48_s30, %s590_s0  ;;  %p596_p7 = scmp.lt.s32.totalorder %s590_s0, %s590_s0 }
  0x32   :  { %p597_p8 = por %p596_p7, %p595_p6 }
  0x34   :  { %p598_p9 = pnand %p597_p8, %p591_p5 }
  0x36   :  { %601 = shalt.err (!%p598_p9)
}
  0x37   :  { %53 = dma.hbm_to_vmem [thread:$0]  %s799_s3, 1024, %s48_s30, [#allocation6], %s655_s11, %s655_s11, %s656_s12  }
  0x38   :  { %s602_s23 = scalar_lea.hbm %s801_s5, 4096 }
  0x39   :  { %p603_p10 = scmp.ne.s32.totalorder %s801_s5, %s602_s23  ;;  %p606_p11 = scmp.lt.u32.totalorder %s602_s23, %s801_s5 }
  0x3b   :  { %p608_p12 = pnand %p606_p11, %p603_p10 }
  0x3d   :  { %611 = shalt.err (!%p608_p12)
}
  0x3e   :  { %s612_s27 = scalar_lea.vmem %s739_s9, 4096  ;;  %p617_p0 = scmp.lt.s32.totalorder %s739_s9, %s739_s9 }
  0x3f   :  { %p613_p13 = scmp.ne.s32.totalorder %s739_s9, %s612_s27  ;;  %p618_p1 = scmp.lt.s32.totalorder %s612_s27, %s612_s27 }
  0x41   :  { %p619_p2 = por %p618_p1, %p617_p0 }
  0x43   :  { %p620_p3 = pnand %p619_p2, %p613_p13 }
  0x45   :  { %623 = shalt.err (!%p620_p3)
}
  0x46   :  { %s662_s3 = smov 256   ;;  %s663_s11 = smov 16  }
  0x47   :  { %67 = dma.hbm_to_vmem [thread:$0]  %s801_s5, 4096, %s739_s9, [#allocation9], %s662_s3, %s662_s3, %s663_s11  }
  0x48   :  { %646 = dma.done.wait [#allocation3], 128  }
  0x49   :  { %647 = vsyncadd [#allocation3], 4294967168 }
  0x4a   :  { %648 = dma.done.wait [#allocation6], 1280  }
  0x4b   :  { %649 = vsyncadd [#allocation6], 4294966016 }
  0x4c   :  { %650 = dma.done.wait [#allocation9], 4096  }
  0x4d   :  { %651 = vsyncadd [#allocation9], 4294963200  ;;  %v664_v0 = vmov 0.0|0.0   ;;  %vm665_vm0 = vmmov 0   ;;  %v666_v1 = vmov 0.0   ;;  %vm96_vm1 = vcmask 1040384  }
  0x4e   :  { %470 = vmatprep.subr.bf16.mxu1 %v664_v0  ;;  %448 = vmatprep.mubr.msk.f32.mxu1 %vm665_vm0, %v666_v1  ;;  %v83_v2 = vld [vmem:[#allocation5] sm:$0xff]  ;;  %v84_v3 = vld [vmem:[#allocation5 + $0x8] sm:$0x1]  ;;  %vm667_vm2 = vmmov 1   ;;  %v171_v5 = vld [vmem:[#allocation7] sm:$0xff]  ;;  %vm92_vm4 = vcmask 72704  }
  0x4f   :  { %369 = vmatprep.mubr.f32.mxu0 %v666_v1  ;;  %vm472_vm3 = vmpackc.low %vm96_vm1, %vm667_vm2  ;;  %v471_v4 = vpack.c.bf16 %v84_v3, %v83_v2  ;;  %v172_v6 = vld [vmem:[#allocation7 + $0x8] sm:$0xff]  ;;  %v173_v9 = vld [vmem:[#allocation7 + $0x10] sm:$0xff]  ;;  %vm186_vm5 = vcmask 523264  }
  0x50   :  { %v82_v7 = vld [vmem:[#allocation2] sm:$0xff]  ;;  %v475_v8 = vpack.c.bf16 %v172_v6, %v171_v5  ;;  %v174_v10 = vld [vmem:[#allocation7 + $0x18] sm:$0xff]  ;;  %v175_v12 = vld [vmem:[#allocation7 + $0x20] sm:$0xff] }
  0x51   :  { %473 = vmatpush3.bf16.msk.msra.mxu1 %vm472_vm3, %v471_v4  ;;  %v478_v11 = vpack.c.bf16 %v174_v10, %v173_v9  ;;  %v176_v13 = vld [vmem:[#allocation7 + $0x28] sm:$0xff]  ;;  %v177_v15 = vld [vmem:[#allocation7 + $0x30] sm:$0xff]  ;;  %v178_v16 = vld [vmem:[#allocation7 + $0x38] sm:$0xff] }
  0x52   :  { %474 = vmatprep.subr.bf16.mxu1 %v664_v0  ;;  %v481_v14 = vpack.c.bf16 %v176_v13, %v175_v12  ;;  %v484_v17 = vpack.c.bf16 %v178_v16, %v177_v15  ;;  %v262_v18 = vld [vmem:[#allocation8 + $0x8] sm:$0xff]  ;;  %v264_v19 = vld [vmem:[#allocation8 + $0x18] sm:$0xff]  ;;  %v261_v20 = vld [vmem:[#allocation8] sm:$0xff]  ;;  %v295_v12 = vlaneseq }
  0x53   :  { %v486_v21 = vpack.c.bf16 %v264_v19, %v262_v18  ;;  %v263_v22 = vld [vmem:[#allocation8 + $0x10] sm:$0xff]  ;;  %v266_v23 = vld [vmem:[#allocation8 + $0x28] sm:$0xff]  ;;  %v268_v24 = vld [vmem:[#allocation8 + $0x38] sm:$0xff] }
  0x54   :  { %449 = vmatmul.mubr.msk.f32.vlgmr.msra.gmra.mrb[0].mxu1 %vm92_vm4, %v82_v7  ;;  %v488_v25 = vpack.c.bf16 %v263_v22, %v261_v20  ;;  %v490_v26 = vpack.c.bf16 %v268_v24, %v266_v23  ;;  %v265_v27 = vld [vmem:[#allocation8 + $0x20] sm:$0xff]  ;;  %v267_v28 = vld [vmem:[#allocation8 + $0x30] sm:$0xff]  ;;  %v270_v29 = vld [vmem:[#allocation8 + $0x48] sm:$0xff]  ;;  %v296_v13 = vshrl.u32 %v295_v12, 7 }
  0x55   :  { %476 = vmatpush3.bf16.msra.mxu1 %v475_v8  ;;  %467 = vmatprep.mubr.msk.f32.mxu1 %vm665_vm0, %v666_v1  ;;  %v272_v30 = vld [vmem:[#allocation8 + $0x58] sm:$0xff]  ;;  %v492_v31 = vpack.c.bf16 %v267_v28, %v265_v27  ;;  %v269_v33 = vld [vmem:[#allocation8 + $0x40] sm:$0xff]  ;;  %v271_v34 = vld [vmem:[#allocation8 + $0x50] sm:$0xff] }
  0x56   :  { %477 = vmatprep.subr.bf16.mxu1 %v664_v0  ;;  %487 = vmatprep.subr.bf16.mxu0 %v486_v21  ;;  %v494_v32 = vpack.c.bf16 %v272_v30, %v270_v29  ;;  %v274_v35 = vld [vmem:[#allocation8 + $0x68] sm:$0xff]  ;;  %v276_v36 = vld [vmem:[#allocation8 + $0x78] sm:$0xff]  ;;  %v496_v37 = vpack.c.bf16 %v271_v34, %v269_v33  ;;  %v273_v39 = vld [vmem:[#allocation8 + $0x60] sm:$0xff]  ;;  %v301_v16 = vsub.s32 1, %v296_v13 }
  0x57   :  { %489 = vmatpush1.bf16.msra.mxu0 %v488_v25  ;;  %v498_v38 = vpack.c.bf16 %v276_v36, %v274_v35  ;;  %v275_v40 = vld [vmem:[#allocation8 + $0x70] sm:$0xff]  ;;  %v278_v41 = vld [vmem:[#allocation8 + $0x88] sm:$0xff]  ;;  %v280_v42 = vld [vmem:[#allocation8 + $0x98] sm:$0xff] }
  0x58   :  { %491 = vmatprep.subr.bf16.mxu0 %v490_v26  ;;  %v500_v43 = vpack.c.bf16 %v275_v40, %v273_v39  ;;  %v502_v44 = vpack.c.bf16 %v280_v42, %v278_v41  ;;  %v277_v45 = vld [vmem:[#allocation8 + $0x80] sm:$0xff]  ;;  %v279_v46 = vld [vmem:[#allocation8 + $0x90] sm:$0xff]  ;;  %v282_v47 = vld [vmem:[#allocation8 + $0xa8] sm:$0xff] }
  0x59   :  { %479 = vmatpush3.bf16.msra.mxu1 %v478_v11  ;;  %v284_v48 = vld [vmem:[#allocation8 + $0xb8] sm:$0xff]  ;;  %v504_v49 = vpack.c.bf16 %v279_v46, %v277_v45  ;;  %v281_v51 = vld [vmem:[#allocation8 + $0xa0] sm:$0xff]  ;;  %v283_v52 = vld [vmem:[#allocation8 + $0xb0] sm:$0xff] }
  0x5a   :  { %480 = vmatprep.subr.bf16.mxu1 %v664_v0  ;;  %v506_v50 = vpack.c.bf16 %v284_v48, %v282_v47  ;;  %v286_v53 = vld [vmem:[#allocation8 + $0xc8] sm:$0xff]  ;;  %v288_v54 = vld [vmem:[#allocation8 + $0xd8] sm:$0xff]  ;;  %v508_v55 = vpack.c.bf16 %v283_v52, %v281_v51  ;;  %v285_v57 = vld [vmem:[#allocation8 + $0xc0] sm:$0xff] }
  0x5b   :  { %493 = vmatpush1.bf16.msra.mxu0 %v492_v31  ;;  %v510_v56 = vpack.c.bf16 %v288_v54, %v286_v53  ;;  %v287_v58 = vld [vmem:[#allocation8 + $0xd0] sm:$0xff]  ;;  %v425_v60 = vld [vmem:[%s798_s2] ss:$0 sm:$0xff]  ;;  %v292_v2 = vld [vmem:[#allocation8 + $0xf8] sm:$0xff] }
  0x5c   :  { %495 = vmatprep.subr.bf16.mxu0 %v494_v32  ;;  %v512_v59 = vpack.c.bf16 %v287_v58, %v285_v57  ;;  %v290_v1 = vld [vmem:[#allocation8 + $0xe8] sm:$0xff]  ;;  %v289_v4 = vld [vmem:[#allocation8 + $0xe0] sm:$0xff]  ;;  %v291_v5 = vld [vmem:[#allocation8 + $0xf0] sm:$0xff] }
  0x5d   :  { %482 = vmatpush3.bf16.msra.mxu1 %v481_v14  ;;  %v514_v3 = vpack.c.bf16 %v292_v2, %v290_v1  ;;  %v516_v6 = vpack.c.bf16 %v291_v5, %v289_v4  ;;  %v428_v7 = vld [vmem:[%s800_s4] ss:$0 sm:$0xff]  ;;  %v297_v14 = vsub.s32 0, %v296_v13 }
  0x5e   :  { %483 = vmatprep.subr.bf16.mxu1 %v664_v0  ;;  %v293_v15 = vld [vmem:[%s802_s6] sm:$0x3] }
  0x5f   :  { %497 = vmatpush1.bf16.msra.mxu0 %v496_v37  ;;  %v298_v19 = vrot.slane %v293_v15, %v297_v14  ;;  %v302_v20 = vrot.slane %v293_v15, %v301_v16 }
  0x60   :  { %499 = vmatprep.subr.bf16.mxu0 %v498_v38 }
  0x61   :  { %485 = vmatpush3.bf16.msra.mxu1 %v484_v17  ;;  %v668_v17 = vmov 1983009808  }
  0x62   :  { %v383_v18 = vunpack.c.l.s4 %v668_v17 }
  0x63   :  { %501 = vmatpush1.bf16.msra.mxu0 %v500_v43 }
  0x64   :  { %503 = vmatprep.subr.bf16.mxu0 %v502_v44  ;;  %v384_v22 = vunpack.c.0.s8 %v383_v18 }
  0x66   :  { %v387_v28 = vsub.s32 %v384_v22, %v296_v13 }
  0x67   :  { %505 = vmatpush1.bf16.msra.mxu0 %v504_v49 }
  0x68   :  { %507 = vmatprep.subr.bf16.mxu0 %v506_v50 }
  0x6b   :  { %509 = vmatpush1.bf16.msra.mxu0 %v508_v55 }
  0x6c   :  { %511 = vmatprep.subr.bf16.mxu0 %v510_v56 }
  0x6f   :  { %513 = vmatpush1.bf16.msra.mxu0 %v512_v59 }
  0x70   :  { %515 = vmatprep.subr.bf16.mxu0 %v514_v3 }
  0x73   :  { %517 = vmatpush1.bf16.msra.mxu0 %v516_v6 }
 0x127   :  { %v166_v61 = vpop.f32.mrb[0].mxu1 }
 0x128   :  { %v167_v62 = vadd.f32 %v425_v60, %v166_v61  ;;  %v450_v63 = vpop.f32.mrb[1].mxu1 }
 0x12a   :  { %v170_v0 = vmax.f32 %v167_v62, 0.0 }
 0x12c   :  { %468 = vmatmul.mubr.msk.f32.vlgmr.msra.gmra.mrb[2].mxu1 %vm186_vm5, %v170_v0 }
 0x1ff   :  { %v256_v8 = vpop.f32.mrb[2].mxu1 }
 0x200   :  { %v257_v9 = vadd.f32 %v428_v7, %v256_v8  ;;  %v469_v10 = vpop.f32.mrb[3].mxu1 }
 0x202   :  { %v260_v11 = vmax.f32 %v257_v9, 0.0 }
 0x204   :  { %370 = vmatmul.mubr.f32.vlgmr.msra.gmra.mrb[0].mxu0 %v260_v11 }
 0x2d7   :  { %v371_v21 = vpop.f32.mrb[0].mxu0 }
 0x2d8   :  { %v372_v23 = vadd.f32 %v371_v21, %v298_v19  ;;  %v373_v24 = vpop.f32.mrb[1].mxu0 }
 0x2d9   :  { %v374_v25 = vadd.f32 %v373_v24, %v302_v20 }
 0x2da   :  { %v376_v26 = vmax.f32 %v372_v23, 0.0 }
 0x2db   :  { %v377_v27 = vmax.f32 %v374_v25, 0.0 }
 0x2dd   :  { %v380_v29 = vcombine.low %v376_v26, %v377_v27  ;;  %v381_v30 = vcombine.high %v376_v26, %v377_v27 }
 0x2df   :  { %v388_v31 = vrot.slane %v380_v29, %v387_v28  ;;  %v395_v32 = vrot.slane %v381_v30, %v387_v28  ;;  %430 = vst.sshfl [vmem:[#allocation10] sm:$0x33 pattern:$0x76325410] %v380_v29 }
 0x2e0   :  { %431 = vst.sshfl [vmem:[#allocation10 + $0x8] sm:$0x33 pattern:$0x76325410] %v381_v30 }
 0x2e1   :  { %v396_v33 = vcombine.high %v388_v31, %v388_v31  ;;  %v397_v34 = vcombine.high %v395_v32, %v395_v32 }
 0x2e3   :  { %403 = vst [vmem:[#allocation10 + $0x4] sm:$0xf] %v396_v33  ;;  %405 = vst [vmem:[#allocation10 + $0xc] sm:$0xf] %v397_v34 }
 0x2e4   :  { %410 = vsyncadd [#allocation4], 192  ;;  %s669_s4 = smov [#allocation10]  }
 0x2e5   :  { %s411_s6 = sshll.u32 %s669_s4, 4  ;;  %s412_s6 = int_to_ptr.vmem [resolvable:$true] %s411_s6 }
 0x2e6   :  { %s624_s10 = scalar_lea.vmem %s412_s6, 64  ;;  %s628_s13 = scalar_lea.vmem %s412_s6, 256 }
 0x2e7   :  { %p625_p4 = scmp.ne.s32.totalorder %s412_s6, %s624_s10  ;;  %p629_p5 = scmp.lt.s32.totalorder %s412_s6, %s412_s6 }
 0x2e8   :  { %p630_p6 = scmp.lt.s32.totalorder %s628_s13, %s624_s10 }
 0x2ea   :  { %p631_p7 = por %p630_p6, %p629_p5 }
 0x2ec   :  { %p632_p8 = pnand %p631_p7, %p625_p4 }
 0x2ee   :  { %635 = shalt.err (!%p632_p8)
}
 0x2ef   :  { %s636_s17 = scalar_lea.hbm %s803_s7, 64 }
 0x2f0   :  { %p637_p9 = scmp.ne.s32.totalorder %s803_s7, %s636_s17  ;;  %p640_p10 = scmp.lt.u32.totalorder %s636_s17, %s803_s7 }
 0x2f2   :  { %p642_p11 = pnand %p640_p10, %p637_p9 }
 0x2f4   :  { %645 = shalt.err (!%p642_p11)
}
 0x2f5   :  { %s670_s20 = smov 64   ;;  %s671_s21 = smov 4  }
 0x2f6   :  { %417 = dma.vmem_to_hbm [thread:$0]  %s412_s6, 64, %s803_s7, [#allocation4], %s670_s20, %s670_s20, %s671_s21  }
 0x2f7   :  { %652 = dma.done.wait [#allocation4], 256  }
 0x2f8   :  { %653 = vsyncadd [#allocation4], 4294967040 }
 0x2f9   :  { %421 = vsyncpa [#allocation3], 1 }
 0x2fa   :  { %422 = vsyncpa [#allocation6], 1 }
 0x2fb   :  { %423 = vsyncpa [#allocation9], 1 }
 0x2fc   :  { %424 = vsyncpa [#allocation4], 1 }

</bundles_post_ra>
